<compile_context>
chip_gen: v5e
topology: v5e:2x2
jax: 0.10.0
libtpu: 0.0.40
codegen_flags: <defaults>
</compile_context>

<pallas_src>
import functools

import jax
import jax.numpy as jnp
from jax.experimental import pallas as pl
from jax.experimental.pallas import tpu as pltpu


# --------------------------------------------------------------------------- #
# Kernels
# --------------------------------------------------------------------------- #
def _pwla_kernel_packed(bnd_ref, kc_ref, x_ref, o_ref, *, N, clip_lo, clip_hi):
    """Piecewise-linear activation on one (tm, tl) tile, packed (K, C) table.

    bnd_ref : SMEM f32[N+1]   segment boundaries [Bl, Bl+d, ..., Bl+(N-1)d, Br]
    kc_ref  : SMEM i32[N+2]   per-segment packed word: bf16(K) in the high 16 bits,
                              bf16(C) in the low 16 bits, C_j = Y_j - B_j * K_j
    x_ref   : VMEM (tm, tl)   input tile (source dtype)
    o_ref   : VMEM (tm, tl)   output tile (source dtype)
    """
    # Compute in f32 regardless of I/O dtype (v5e has no bf16 VALU; accuracy).
    x = x_ref[...].astype(jnp.float32)
    if clip_lo is not None:
        x = jnp.clip(x, clip_lo, clip_hi)

    # Start in the leftmost segment, then monotone threshold chain: the active
    # segment is the last j with x >= bnd[j].  One cmp + one 32-bit select each.
    kc = jnp.full(x.shape, kc_ref[0], dtype=jnp.int32)
    for j in range(N + 1):
        kc = jnp.where(x >= bnd_ref[j], kc_ref[j + 1], kc)

    # Unpack once: bf16 bits placed in the top half of an f32 word equal the bf16
    # value exactly.  -65536 == 0xFFFF0000 as int32.
    k = pltpu.bitcast(kc & jnp.int32(-65536), jnp.float32)
    c = pltpu.bitcast(kc << 16, jnp.float32)

    o_ref[...] = (x * k + c).astype(o_ref.dtype)


def _pwla_kernel_f32(bnd_ref, kseg_ref, cseg_ref, x_ref, o_ref, *, N, clip_lo, clip_hi):
    """Exact-f32-table variant (1 cmp + 2 selects per segment)."""
    x = x_ref[...].astype(jnp.float32)
    if clip_lo is not None:
        x = jnp.clip(x, clip_lo, clip_hi)

    k = jnp.full(x.shape, kseg_ref[0], dtype=jnp.float32)
    c = jnp.full(x.shape, cseg_ref[0], dtype=jnp.float32)
    for j in range(N + 1):
        m = x >= bnd_ref[j]
        k = jnp.where(m, kseg_ref[j + 1], k)
        c = jnp.where(m, cseg_ref[j + 1], c)

    o_ref[...] = (x * k + c).astype(o_ref.dtype)


# --------------------------------------------------------------------------- #
# Host-side table construction
# --------------------------------------------------------------------------- #
def _build_tables(Bl, Br, Kl, Kr, yidx, N):
    """Precompute per-segment (boundary, slope, offset) tables (tiny, traced)."""
    Bl = jnp.asarray(Bl, jnp.float32)
    Br = jnp.asarray(Br, jnp.float32)
    Kl = jnp.asarray(Kl, jnp.float32)
    Kr = jnp.asarray(Kr, jnp.float32)
    yidx = jnp.asarray(yidx, jnp.float32)

    d = (Br - Bl) / N
    b_mid = Bl + jnp.arange(N, dtype=jnp.float32) * d          # B_j of middle segments
    k_mid = (yidx[1:] - yidx[:-1]) / d                         # slopes K_j
    c_mid = yidx[:-1] - b_mid * k_mid                          # offsets C_j

    k_seg = jnp.concatenate([Kl[None], k_mid, Kr[None]])
    c_seg = jnp.concatenate(
        [(yidx[0] - Bl * Kl)[None], c_mid, (yidx[N] - Br * Kr)[None]])
    # bnd[0] = Bl exactly, bnd[N] = Br exactly (matches x<Bl / x>=Br masks).
    bnd = jnp.concatenate([b_mid, Br[None]])
    return bnd, k_seg, c_seg


def _pack_kc(k_seg, c_seg):
    """Pack bf16(K) | bf16(C) into one int32 word per segment (host-side, tiny)."""
    k_bits = jax.lax.bitcast_convert_type(
        k_seg.astype(jnp.bfloat16), jnp.uint16).astype(jnp.uint32)
    c_bits = jax.lax.bitcast_convert_type(
        c_seg.astype(jnp.bfloat16), jnp.uint16).astype(jnp.uint32)
    packed = (k_bits << 16) | c_bits
    return jax.lax.bitcast_convert_type(packed, jnp.int32)


def make_pwla_params(N=16):
    """Deterministic parameter init matching PWLA2d.__init__."""
    Bl = jnp.float32(-5.0)
    Br = jnp.float32(5.0)
    Kl = jnp.float32(0.0)
    Kr = jnp.float32(1.0)
    yidx = jax.nn.relu(jnp.linspace(-5.0, 5.0, N + 1, dtype=jnp.float32))
    return Bl, Br, Kl, Kr, yidx


# --------------------------------------------------------------------------- #
# Public wrapper
# --------------------------------------------------------------------------- #
def pwla2d_learnable_activation(x, Bl, Br, Kl, Kr, yidx, *, N=16,
                                min_x=None, max_x=None, tm=512, tl=1024,
                                pack_kc=True):
    """Forward pass of PWLA2dLearnableActivation (inference path, mode=1)."""
    # Mirror torch's `if self.min_x and self.max_x:` truthiness check (0.0 disables).
    apply_clip = bool(min_x and max_x)
    clip_lo = float(min_x) if apply_clip else None
    clip_hi = float(max_x) if apply_clip else None

    bnd, k_seg, c_seg = _build_tables(Bl, Br, Kl, Kr, yidx, N)

    orig_shape = x.shape
    orig_dtype = x.dtype
    flat = x.reshape(-1)                      # bitcast for row-major layouts
    n = flat.shape[0]

    # Pick the widest lane-dense width (multiple of 128) that divides n so the
    # 2-D view is a free bitcast; only pad (one extra HBM copy) when unavoidable.
    tl_eff = None
    for cand in (1024, 512, 256, 128):
        if cand <= tl and n % cand == 0:
            tl_eff = cand
            break
    pad = 0
    if tl_eff is None:
        tl_eff = min(tl, 1024)
        pad = (-n) % tl_eff
        flat = jnp.pad(flat, (0, pad))

    xm = flat.reshape(-1, tl_eff)
    rows = xm.shape[0]

    # Row-block size: cap at tm; if everything fits in one block, split into two
    # row-blocks (multiples of 8) when possible so both v7x TensorCores get work.
    if rows > tm:
        tm_eff = tm
    elif rows >= 16:
        half = (rows + 1) // 2
        tm_eff = ((half + 7) // 8) * 8
    else:
        tm_eff = rows                          # full-extent block (always legal)
    grid = (pl.cdiv(rows, tm_eff),)

    n_total = rows * tl_eff
    itemsize = jnp.dtype(orig_dtype).itemsize
    cost = pl.CostEstimate(
        flops=(3 * (N + 1) + 6) * n_total,
        transcendentals=0,
        bytes_accessed=2 * n_total * itemsize)

    if pack_kc:
        kernel = functools.partial(_pwla_kernel_packed, N=N,
                                   clip_lo=clip_lo, clip_hi=clip_hi)
        tables = (bnd, _pack_kc(k_seg, c_seg))
    else:
        kernel = functools.partial(_pwla_kernel_f32, N=N,
                                   clip_lo=clip_lo, clip_hi=clip_hi)
        tables = (bnd, k_seg, c_seg)

    table_specs = [pl.BlockSpec(memory_space=pltpu.MemorySpace.SMEM)] * len(tables)

    out = pl.pallas_call(
        kernel,
        out_shape=jax.ShapeDtypeStruct((rows, tl_eff), orig_dtype),
        grid=grid,
        in_specs=table_specs + [pl.BlockSpec((tm_eff, tl_eff), lambda i: (i, 0))],
        out_specs=pl.BlockSpec((tm_eff, tl_eff), lambda i: (i, 0)),
        compiler_params=pltpu.CompilerParams(dimension_semantics=("parallel",)),
        cost_estimate=cost,
    )(*tables, xm)

    out_flat = out.reshape(-1)
    if pad:
        out_flat = out_flat[:n]
    return out_flat.reshape(orig_shape)


# --------------------------------------------------------------------------- #
# Pure-JAX reference mirroring the PyTorch forward (mode=1)
# --------------------------------------------------------------------------- #
def _pwla_reference(x, Bl, Br, Kl, Kr, yidx, N=16):
    d = (Br - Bl) / N
    ind = jnp.clip(jnp.floor((x - Bl) / d), 0, N - 1)
    ind_i = ind.astype(jnp.int32)
    Bdata = Bl + ind * d
    mask_bl = (x < Bl).astype(x.dtype)
    mask_br = (x >= Br).astype(x.dtype)
    mask_ot = 1.0 - jnp.maximum(mask_bl, mask_br)
    Ydata = yidx[ind_i]
    Kdata = (yidx[ind_i + 1] - yidx[ind_i]) / d
    return (mask_bl * ((x - Bl) * Kl + yidx[0])
            + mask_br * ((x - Br) * Kr + yidx[-1])
            + mask_ot * ((x - Bdata) * Kdata + Ydata))


if __name__ == "__main__":
    N = 16
    Bl, Br, Kl, Kr, yidx = make_pwla_params(N)
    key = jax.random.PRNGKey(0)

    # --- main test: NCHW conv-style input, small shape, default (relu-init) params
    x = jax.random.normal(key, (2, 4, 16, 16), dtype=jnp.float32) * 4.0
    fwd = jax.jit(functools.partial(pwla2d_learnable_activation, N=N))
    out = jax.block_until_ready(fwd(x, Bl, Br, Kl, Kr, yidx))
    ref = _pwla_reference(x, Bl, Br, Kl, Kr, yidx, N=N)
    assert out.shape == x.shape and out.dtype == x.dtype
    assert jnp.allclose(out, ref, atol=2e-5, rtol=1e-5), "mismatch (default params)"

    # --- perturbed ("learned") params, exact f32-table path: tight tolerance
    yidx2 = yidx + 0.05 * jax.random.normal(jax.random.PRNGKey(1), yidx.shape,
                                            dtype=jnp.float32)
    Kl2, Kr2 = jnp.float32(0.1), jnp.float32(0.9)
    fwd_exact = jax.jit(functools.partial(pwla2d_learnable_activation, N=N,
                                          pack_kc=False))
    out2 = jax.block_until_ready(fwd_exact(x, Bl, Br, Kl2, Kr2, yidx2))
    ref2 = _pwla_reference(x, Bl, Br, Kl2, Kr2, yidx2, N=N)
    assert jnp.allclose(out2, ref2, atol=2e-5, rtol=1e-5), "mismatch (exact path)"

    # --- perturbed params, packed path: bf16-quantized K/C (activation-level accuracy)
    out2p = jax.block_until_ready(fwd(x, Bl, Br, Kl2, Kr2, yidx2))
    assert jnp.allclose(out2p, ref2, atol=1e-1, rtol=0), "mismatch (packed path)"

    # --- clamping path folded into the kernel
    fwd_clip = jax.jit(functools.partial(pwla2d_learnable_activation, N=N,
                                         min_x=-3.0, max_x=3.0))
    out3 = jax.block_until_ready(fwd_clip(x, Bl, Br, Kl, Kr, yidx))
    ref3 = _pwla_reference(jnp.clip(x, -3.0, 3.0), Bl, Br, Kl, Kr, yidx, N=N)
    assert jnp.allclose(out3, ref3, atol=2e-5, rtol=1e-5), "mismatch (clip path)"

    # --- bf16 I/O (same kernel, f32 compute) and the 2-step grid path (rows=32)
    xb = (jax.random.normal(jax.random.PRNGKey(2), (2, 4, 64, 64),
                            dtype=jnp.float32) * 4.0).astype(jnp.bfloat16)
    outb = jax.block_until_ready(fwd(xb, Bl, Br, Kl, Kr, yidx))
    refb = _pwla_reference(xb.astype(jnp.float32), Bl, Br, Kl, Kr, yidx, N=N)
    assert outb.dtype == jnp.bfloat16 and outb.shape == xb.shape
    assert jnp.allclose(outb.astype(jnp.float32), refb, atol=5e-2), "mismatch (bf16)"

    # --- element count not a multiple of 1024: adaptive lane width (no pad pass)
    xs = jax.random.normal(jax.random.PRNGKey(3), (2, 3, 16, 16),
                           dtype=jnp.float32) * 4.0
    outs = jax.block_until_ready(fwd(xs, Bl, Br, Kl, Kr, yidx))
    refs = _pwla_reference(xs, Bl, Br, Kl, Kr, yidx, N=N)
    assert jnp.allclose(outs, refs, atol=2e-5, rtol=1e-5), "mismatch (1536 elems)"

    print("KERNEL_OK")
</pallas_src>

<mosaic_0001>
module attributes {stable_mosaic.version = 11 : i64} {
  func.func @_pwla_kernel_packed(%arg0: i32, %arg1: memref<17xf32, #tpu.memory_space<smem>>, %arg2: memref<18xi32, #tpu.memory_space<smem>>, %arg3: memref<2x1024xf32, #tpu.memory_space<vmem>>, %arg4: memref<2x1024xf32, #tpu.memory_space<vmem>>) attributes {dimension_semantics = [#tpu.dimension_semantics<parallel>], iteration_bounds = array<i64: 1>, scalar_prefetch = 0 : i64, scratch_operands = 0 : i64, tpu.core_type = #tpu.core_type<tc>, window_params = [{transform_indices = @transform_0, window_bounds = array<i64: 17>}, {transform_indices = @transform_1, window_bounds = array<i64: 18>}, {transform_indices = @transform_2, window_bounds = array<i64: 2, 1024>}, {transform_indices = @transform_3, window_bounds = array<i64: 2, 1024>}]} {
    %c0 = arith.constant 0 : index
    %c0_0 = arith.constant 0 : index
    %0 = vector.load %arg3[%c0, %c0_0] : memref<2x1024xf32, #tpu.memory_space<vmem>>, vector<2x1024xf32>
    %c0_1 = arith.constant 0 : index
    %1 = memref.load %arg2[%c0_1] : memref<18xi32, #tpu.memory_space<smem>>
    %2 = vector.broadcast %1 : i32 to vector<2x1024xi32>
    %c0_2 = arith.constant 0 : index
    %3 = memref.load %arg1[%c0_2] : memref<17xf32, #tpu.memory_space<smem>>
    %4 = vector.broadcast %3 : f32 to vector<2x1024xf32>
    %5 = arith.cmpf oge, %0, %4 : vector<2x1024xf32>
    %c1 = arith.constant 1 : index
    %6 = memref.load %arg2[%c1] : memref<18xi32, #tpu.memory_space<smem>>
    %7 = vector.broadcast %6 : i32 to vector<2x1024xi32>
    %8 = arith.select %5, %7, %2 : vector<2x1024xi1>, vector<2x1024xi32>
    %c1_3 = arith.constant 1 : index
    %9 = memref.load %arg1[%c1_3] : memref<17xf32, #tpu.memory_space<smem>>
    %10 = vector.broadcast %9 : f32 to vector<2x1024xf32>
    %11 = arith.cmpf oge, %0, %10 : vector<2x1024xf32>
    %c2 = arith.constant 2 : index
    %12 = memref.load %arg2[%c2] : memref<18xi32, #tpu.memory_space<smem>>
    %13 = vector.broadcast %12 : i32 to vector<2x1024xi32>
    %14 = arith.select %11, %13, %8 : vector<2x1024xi1>, vector<2x1024xi32>
    %c2_4 = arith.constant 2 : index
    %15 = memref.load %arg1[%c2_4] : memref<17xf32, #tpu.memory_space<smem>>
    %16 = vector.broadcast %15 : f32 to vector<2x1024xf32>
    %17 = arith.cmpf oge, %0, %16 : vector<2x1024xf32>
    %c3 = arith.constant 3 : index
    %18 = memref.load %arg2[%c3] : memref<18xi32, #tpu.memory_space<smem>>
    %19 = vector.broadcast %18 : i32 to vector<2x1024xi32>
    %20 = arith.select %17, %19, %14 : vector<2x1024xi1>, vector<2x1024xi32>
    %c3_5 = arith.constant 3 : index
    %21 = memref.load %arg1[%c3_5] : memref<17xf32, #tpu.memory_space<smem>>
    %22 = vector.broadcast %21 : f32 to vector<2x1024xf32>
    %23 = arith.cmpf oge, %0, %22 : vector<2x1024xf32>
    %c4 = arith.constant 4 : index
    %24 = memref.load %arg2[%c4] : memref<18xi32, #tpu.memory_space<smem>>
    %25 = vector.broadcast %24 : i32 to vector<2x1024xi32>
    %26 = arith.select %23, %25, %20 : vector<2x1024xi1>, vector<2x1024xi32>
    %c4_6 = arith.constant 4 : index
    %27 = memref.load %arg1[%c4_6] : memref<17xf32, #tpu.memory_space<smem>>
    %28 = vector.broadcast %27 : f32 to vector<2x1024xf32>
    %29 = arith.cmpf oge, %0, %28 : vector<2x1024xf32>
    %c5 = arith.constant 5 : index
    %30 = memref.load %arg2[%c5] : memref<18xi32, #tpu.memory_space<smem>>
    %31 = vector.broadcast %30 : i32 to vector<2x1024xi32>
    %32 = arith.select %29, %31, %26 : vector<2x1024xi1>, vector<2x1024xi32>
    %c5_7 = arith.constant 5 : index
    %33 = memref.load %arg1[%c5_7] : memref<17xf32, #tpu.memory_space<smem>>
    %34 = vector.broadcast %33 : f32 to vector<2x1024xf32>
    %35 = arith.cmpf oge, %0, %34 : vector<2x1024xf32>
    %c6 = arith.constant 6 : index
    %36 = memref.load %arg2[%c6] : memref<18xi32, #tpu.memory_space<smem>>
    %37 = vector.broadcast %36 : i32 to vector<2x1024xi32>
    %38 = arith.select %35, %37, %32 : vector<2x1024xi1>, vector<2x1024xi32>
    %c6_8 = arith.constant 6 : index
    %39 = memref.load %arg1[%c6_8] : memref<17xf32, #tpu.memory_space<smem>>
    %40 = vector.broadcast %39 : f32 to vector<2x1024xf32>
    %41 = arith.cmpf oge, %0, %40 : vector<2x1024xf32>
    %c7 = arith.constant 7 : index
    %42 = memref.load %arg2[%c7] : memref<18xi32, #tpu.memory_space<smem>>
    %43 = vector.broadcast %42 : i32 to vector<2x1024xi32>
    %44 = arith.select %41, %43, %38 : vector<2x1024xi1>, vector<2x1024xi32>
    %c7_9 = arith.constant 7 : index
    %45 = memref.load %arg1[%c7_9] : memref<17xf32, #tpu.memory_space<smem>>
    %46 = vector.broadcast %45 : f32 to vector<2x1024xf32>
    %47 = arith.cmpf oge, %0, %46 : vector<2x1024xf32>
    %c8 = arith.constant 8 : index
    %48 = memref.load %arg2[%c8] : memref<18xi32, #tpu.memory_space<smem>>
    %49 = vector.broadcast %48 : i32 to vector<2x1024xi32>
    %50 = arith.select %47, %49, %44 : vector<2x1024xi1>, vector<2x1024xi32>
    %c8_10 = arith.constant 8 : index
    %51 = memref.load %arg1[%c8_10] : memref<17xf32, #tpu.memory_space<smem>>
    %52 = vector.broadcast %51 : f32 to vector<2x1024xf32>
    %53 = arith.cmpf oge, %0, %52 : vector<2x1024xf32>
    %c9 = arith.constant 9 : index
    %54 = memref.load %arg2[%c9] : memref<18xi32, #tpu.memory_space<smem>>
    %55 = vector.broadcast %54 : i32 to vector<2x1024xi32>
    %56 = arith.select %53, %55, %50 : vector<2x1024xi1>, vector<2x1024xi32>
    %c9_11 = arith.constant 9 : index
    %57 = memref.load %arg1[%c9_11] : memref<17xf32, #tpu.memory_space<smem>>
    %58 = vector.broadcast %57 : f32 to vector<2x1024xf32>
    %59 = arith.cmpf oge, %0, %58 : vector<2x1024xf32>
    %c10 = arith.constant 10 : index
    %60 = memref.load %arg2[%c10] : memref<18xi32, #tpu.memory_space<smem>>
    %61 = vector.broadcast %60 : i32 to vector<2x1024xi32>
    %62 = arith.select %59, %61, %56 : vector<2x1024xi1>, vector<2x1024xi32>
    %c10_12 = arith.constant 10 : index
    %63 = memref.load %arg1[%c10_12] : memref<17xf32, #tpu.memory_space<smem>>
    %64 = vector.broadcast %63 : f32 to vector<2x1024xf32>
    %65 = arith.cmpf oge, %0, %64 : vector<2x1024xf32>
    %c11 = arith.constant 11 : index
    %66 = memref.load %arg2[%c11] : memref<18xi32, #tpu.memory_space<smem>>
    %67 = vector.broadcast %66 : i32 to vector<2x1024xi32>
    %68 = arith.select %65, %67, %62 : vector<2x1024xi1>, vector<2x1024xi32>
    %c11_13 = arith.constant 11 : index
    %69 = memref.load %arg1[%c11_13] : memref<17xf32, #tpu.memory_space<smem>>
    %70 = vector.broadcast %69 : f32 to vector<2x1024xf32>
    %71 = arith.cmpf oge, %0, %70 : vector<2x1024xf32>
    %c12 = arith.constant 12 : index
    %72 = memref.load %arg2[%c12] : memref<18xi32, #tpu.memory_space<smem>>
    %73 = vector.broadcast %72 : i32 to vector<2x1024xi32>
    %74 = arith.select %71, %73, %68 : vector<2x1024xi1>, vector<2x1024xi32>
    %c12_14 = arith.constant 12 : index
    %75 = memref.load %arg1[%c12_14] : memref<17xf32, #tpu.memory_space<smem>>
    %76 = vector.broadcast %75 : f32 to vector<2x1024xf32>
    %77 = arith.cmpf oge, %0, %76 : vector<2x1024xf32>
    %c13 = arith.constant 13 : index
    %78 = memref.load %arg2[%c13] : memref<18xi32, #tpu.memory_space<smem>>
    %79 = vector.broadcast %78 : i32 to vector<2x1024xi32>
    %80 = arith.select %77, %79, %74 : vector<2x1024xi1>, vector<2x1024xi32>
    %c13_15 = arith.constant 13 : index
    %81 = memref.load %arg1[%c13_15] : memref<17xf32, #tpu.memory_space<smem>>
    %82 = vector.broadcast %81 : f32 to vector<2x1024xf32>
    %83 = arith.cmpf oge, %0, %82 : vector<2x1024xf32>
    %c14 = arith.constant 14 : index
    %84 = memref.load %arg2[%c14] : memref<18xi32, #tpu.memory_space<smem>>
    %85 = vector.broadcast %84 : i32 to vector<2x1024xi32>
    %86 = arith.select %83, %85, %80 : vector<2x1024xi1>, vector<2x1024xi32>
    %c14_16 = arith.constant 14 : index
    %87 = memref.load %arg1[%c14_16] : memref<17xf32, #tpu.memory_space<smem>>
    %88 = vector.broadcast %87 : f32 to vector<2x1024xf32>
    %89 = arith.cmpf oge, %0, %88 : vector<2x1024xf32>
    %c15 = arith.constant 15 : index
    %90 = memref.load %arg2[%c15] : memref<18xi32, #tpu.memory_space<smem>>
    %91 = vector.broadcast %90 : i32 to vector<2x1024xi32>
    %92 = arith.select %89, %91, %86 : vector<2x1024xi1>, vector<2x1024xi32>
    %c15_17 = arith.constant 15 : index
    %93 = memref.load %arg1[%c15_17] : memref<17xf32, #tpu.memory_space<smem>>
    %94 = vector.broadcast %93 : f32 to vector<2x1024xf32>
    %95 = arith.cmpf oge, %0, %94 : vector<2x1024xf32>
    %c16 = arith.constant 16 : index
    %96 = memref.load %arg2[%c16] : memref<18xi32, #tpu.memory_space<smem>>
    %97 = vector.broadcast %96 : i32 to vector<2x1024xi32>
    %98 = arith.select %95, %97, %92 : vector<2x1024xi1>, vector<2x1024xi32>
    %c16_18 = arith.constant 16 : index
    %99 = memref.load %arg1[%c16_18] : memref<17xf32, #tpu.memory_space<smem>>
    %100 = vector.broadcast %99 : f32 to vector<2x1024xf32>
    %101 = arith.cmpf oge, %0, %100 : vector<2x1024xf32>
    %c17 = arith.constant 17 : index
    %102 = memref.load %arg2[%c17] : memref<18xi32, #tpu.memory_space<smem>>
    %103 = vector.broadcast %102 : i32 to vector<2x1024xi32>
    %104 = arith.select %101, %103, %98 : vector<2x1024xi1>, vector<2x1024xi32>
    %c-65536_i32 = arith.constant -65536 : i32
    %105 = vector.broadcast %c-65536_i32 : i32 to vector<2x1024xi32>
    %106 = arith.andi %104, %105 : vector<2x1024xi32>
    %107 = tpu.bitcast %106 : vector<2x1024xi32> -> vector<2x1024xf32>
    %c16_i32 = arith.constant 16 : i32
    %108 = vector.broadcast %c16_i32 : i32 to vector<2x1024xi32>
    %109 = arith.shli %104, %108 : vector<2x1024xi32>
    %110 = tpu.bitcast %109 : vector<2x1024xi32> -> vector<2x1024xf32>
    %111 = arith.mulf %0, %107 : vector<2x1024xf32>
    %112 = arith.addf %111, %110 : vector<2x1024xf32>
    %c0_19 = arith.constant 0 : index
    %c0_20 = arith.constant 0 : index
    %113 = vector.load %arg4[%c0_19, %c0_20] : memref<2x1024xf32, #tpu.memory_space<vmem>>, vector<2x1024xf32>
    tpu.vector_store %arg4[%c0_19, %c0_20], %112 {strides = array<i32>} : memref<2x1024xf32, #tpu.memory_space<vmem>>, vector<2x1024xf32>,
    return
  }
  func.func @transform_0(%arg0: i32) -> i32 {
    %c0_i32 = arith.constant 0 : i32
    %c0_i32_0 = arith.constant 0 : i32
    return %c0_i32 : i32
  }
  func.func @transform_1(%arg0: i32) -> i32 {
    %c0_i32 = arith.constant 0 : i32
    %c0_i32_0 = arith.constant 0 : i32
    return %c0_i32 : i32
  }
  func.func @transform_2(%arg0: i32) -> (i32, i32) {
    %c0_i32 = arith.constant 0 : i32
    %c0_i32_0 = arith.constant 0 : i32
    return %arg0, %c0_i32 : i32, i32
  }
  func.func @transform_3(%arg0: i32) -> (i32, i32) {
    %c0_i32 = arith.constant 0 : i32
    %c0_i32_0 = arith.constant 0 : i32
    return %arg0, %c0_i32 : i32, i32
  }
}

</mosaic_0001>

<bundles_post_ra>
// kernel: pwla2d_learnable_activation.1
= control target key start
LH: loop header
LB: loop body
LE: loop exit
PB: predicated region body
PF: predicated region fallthrough
CT: control target
= control target key end

     0   :  { %8 = vsyncpa [#allocation3], 0  ;;  %s403_s0 = inlined_call_operand.vmem [shape: f32[17], index: 0, kind: input, shape index: {}]   ;;  %s404_s1 = inlined_call_operand.vmem [shape: s32[18], index: 1, kind: input, shape index: {}]   ;;  %s405_s2 = inlined_call_operand.vmem [shape: f32[2,1024], index: 2, kind: input, shape index: {}]   ;;  %s406_s3 = inlined_call_operand.vmem [shape: f32[2,1024], index: 3, kind: output, shape index: {}]  }
   0x1   :  { %s15_s14 = sshll.u32 %s403_s0, 4  ;;  %s16_s14 = int_to_ptr.vmem [resolvable:$true] %s15_s14 }
   0x2   :  { %9 = vsyncpa [#allocation5], 0  ;;  %s24_s17 = sshll.u32 %s404_s1, 4  ;;  %s311_s18 = smov [#allocation2]   ;;  %s25_s17 = int_to_ptr.vmem [resolvable:$true] %s24_s17 }
   0x3   :  { %18 = dma.vmem_to_smem %s16_s14, 16, %s311_s18, [#allocation3]  }
   0x4   :  { %s312_s19 = smov [#allocation4]  }
   0x5   :  { %27 = dma.vmem_to_smem %s25_s17, 16, %s312_s19, [#allocation5]  }
   0x6   :  { %307 = dma.done.wait [#allocation3], 16  }
   0x7   :  { %308 = vsyncadd [#allocation3], 4294967280 }
   0x8   :  { %309 = dma.done.wait [#allocation5], 16  }
   0x9   :  { %310 = vsyncadd [#allocation5], 4294967280 }
   0xa   :  { %38 = sfence }
   0xb   :  { %s41_s20 = sld [smem:[#allocation4]]  ;;  %v342_v0 = vld [vmem:[%s405_s2] sm:$0xff]  ;;  %v347_v1 = vld [vmem:[%s405_s2 + $0x8] sm:$0xff] }
   0xc   :  { %s43_s21 = sld [smem:[#allocation2]] }
   0xd   :  { %s248_s22 = sld [smem:[#allocation4 + $0x1]] }
   0xe   :  { %s249_s0 = sld [smem:[#allocation2 + $0x1]] }
   0xf   :  { %s250_s23 = sld [smem:[#allocation4 + $0x2]] }
  0x10   :  { %s251_s1 = sld [smem:[#allocation2 + $0x2]] }
  0x11   :  { %v42_v2 = vstv %s41_s20  ;;  %s252_s28 = sld [smem:[#allocation4 + $0x3]] }
  0x12   :  { %v44_v3 = vstv %s43_s21  ;;  %s253_s29 = sld [smem:[#allocation2 + $0x3]] }
  0x13   :  { %vm45_vm0 = vcmp.ge.f32.partialorder %v342_v0, %v44_v3  ;;  %v48_v4 = vstv %s248_s22  ;;  %s254_s30 = sld [smem:[#allocation4 + $0x4]]  ;;  %vm46_vm1 = vcmp.ge.f32.partialorder %v347_v1, %v44_v3 }
  0x14   :  { %v49_v5 = vsel %vm45_vm0, %v48_v4, %v42_v2  ;;  %v52_v6 = vstv %s249_s0  ;;  %s255_s4 = sld [smem:[#allocation2 + $0x4]]  ;;  %v50_v7 = vsel %vm46_vm1, %v48_v4, %v42_v2 }
  0x15   :  { %vm53_vm2 = vcmp.ge.f32.partialorder %v342_v0, %v52_v6  ;;  %v56_v8 = vstv %s250_s23  ;;  %s256_s5 = sld [smem:[#allocation4 + $0x5]]  ;;  %vm54_vm3 = vcmp.ge.f32.partialorder %v347_v1, %v52_v6 }
  0x16   :  { %v57_v9 = vsel %vm53_vm2, %v56_v8, %v49_v5  ;;  %v60_v10 = vstv %s251_s1  ;;  %s257_s2 = sld [smem:[#allocation2 + $0x5]]  ;;  %v58_v11 = vsel %vm54_vm3, %v56_v8, %v50_v7 }
  0x17   :  { %vm61_vm4 = vcmp.ge.f32.partialorder %v342_v0, %v60_v10  ;;  %v64_v12 = vstv %s252_s28  ;;  %s258_s6 = sld [smem:[#allocation4 + $0x6]]  ;;  %vm62_vm5 = vcmp.ge.f32.partialorder %v347_v1, %v60_v10 }
  0x18   :  { %v65_v13 = vsel %vm61_vm4, %v64_v12, %v57_v9  ;;  %v68_v14 = vstv %s253_s29  ;;  %s259_s7 = sld [smem:[#allocation2 + $0x6]]  ;;  %v66_v15 = vsel %vm62_vm5, %v64_v12, %v58_v11 }
  0x19   :  { %vm69_vm6 = vcmp.ge.f32.partialorder %v342_v0, %v68_v14  ;;  %v72_v16 = vstv %s254_s30  ;;  %s260_s8 = sld [smem:[#allocation4 + $0x7]]  ;;  %vm70_vm7 = vcmp.ge.f32.partialorder %v347_v1, %v68_v14 }
  0x1a   :  { %v73_v17 = vsel %vm69_vm6, %v72_v16, %v65_v13  ;;  %v76_v18 = vstv %s255_s4  ;;  %s261_s9 = sld [smem:[#allocation2 + $0x7]]  ;;  %v74_v19 = vsel %vm70_vm7, %v72_v16, %v66_v15 }
  0x1b   :  { %vm77_vm8 = vcmp.ge.f32.partialorder %v342_v0, %v76_v18  ;;  %v80_v20 = vstv %s256_s5  ;;  %s262_s10 = sld [smem:[#allocation4 + $0x8]]  ;;  %vm78_vm9 = vcmp.ge.f32.partialorder %v347_v1, %v76_v18 }
  0x1c   :  { %v81_v21 = vsel %vm77_vm8, %v80_v20, %v73_v17  ;;  %v84_v22 = vstv %s257_s2  ;;  %s263_s11 = sld [smem:[#allocation2 + $0x8]]  ;;  %v82_v23 = vsel %vm78_vm9, %v80_v20, %v74_v19 }
  0x1d   :  { %vm85_vm10 = vcmp.ge.f32.partialorder %v342_v0, %v84_v22  ;;  %v88_v24 = vstv %s258_s6  ;;  %s264_s12 = sld [smem:[#allocation4 + $0x9]]  ;;  %vm86_vm11 = vcmp.ge.f32.partialorder %v347_v1, %v84_v22 }
  0x1e   :  { %v89_v25 = vsel %vm85_vm10, %v88_v24, %v81_v21  ;;  %v92_v26 = vstv %s259_s7  ;;  %s265_s13 = sld [smem:[#allocation2 + $0x9]]  ;;  %v90_v27 = vsel %vm86_vm11, %v88_v24, %v82_v23 }
  0x1f   :  { %vm93_vm12 = vcmp.ge.f32.partialorder %v342_v0, %v92_v26  ;;  %v96_v28 = vstv %s260_s8  ;;  %s266_s14 = sld [smem:[#allocation4 + $0xa]]  ;;  %vm94_vm13 = vcmp.ge.f32.partialorder %v347_v1, %v92_v26 }
  0x20   :  { %v97_v29 = vsel %vm93_vm12, %v96_v28, %v89_v25  ;;  %v100_v30 = vstv %s261_s9  ;;  %s267_s15 = sld [smem:[#allocation2 + $0xa]]  ;;  %v98_v31 = vsel %vm94_vm13, %v96_v28, %v90_v27 }
  0x21   :  { %vm101_vm14 = vcmp.ge.f32.partialorder %v342_v0, %v100_v30  ;;  %v104_v32 = vstv %s262_s10  ;;  %s268_s16 = sld [smem:[#allocation4 + $0xb]]  ;;  %vm102_vm15 = vcmp.ge.f32.partialorder %v347_v1, %v100_v30 }
  0x22   :  { %v105_v33 = vsel %vm101_vm14, %v104_v32, %v97_v29  ;;  %v108_v34 = vstv %s263_s11  ;;  %s269_s17 = sld [smem:[#allocation2 + $0xb]]  ;;  %v106_v35 = vsel %vm102_vm15, %v104_v32, %v98_v31 }
  0x23   :  { %vm109_vm0 = vcmp.ge.f32.partialorder %v342_v0, %v108_v34  ;;  %v112_v36 = vstv %s264_s12  ;;  %s270_s18 = sld [smem:[#allocation4 + $0xc]]  ;;  %vm110_vm1 = vcmp.ge.f32.partialorder %v347_v1, %v108_v34 }
  0x24   :  { %v113_v37 = vsel %vm109_vm0, %v112_v36, %v105_v33  ;;  %v116_v38 = vstv %s265_s13  ;;  %s271_s19 = sld [smem:[#allocation2 + $0xc]]  ;;  %v114_v39 = vsel %vm110_vm1, %v112_v36, %v106_v35 }
  0x25   :  { %vm117_vm2 = vcmp.ge.f32.partialorder %v342_v0, %v116_v38  ;;  %v120_v40 = vstv %s266_s14  ;;  %s272_s20 = sld [smem:[#allocation4 + $0xd]]  ;;  %vm118_vm3 = vcmp.ge.f32.partialorder %v347_v1, %v116_v38 }
  0x26   :  { %v121_v41 = vsel %vm117_vm2, %v120_v40, %v113_v37  ;;  %v124_v42 = vstv %s267_s15  ;;  %s273_s21 = sld [smem:[#allocation2 + $0xd]]  ;;  %v122_v43 = vsel %vm118_vm3, %v120_v40, %v114_v39  ;;  %vm211_vm2 = vcmask 1041408  }
  0x27   :  { %vm125_vm4 = vcmp.ge.f32.partialorder %v342_v0, %v124_v42  ;;  %v128_v44 = vstv %s268_s16  ;;  %s274_s22 = sld [smem:[#allocation4 + $0xe]]  ;;  %vm126_vm5 = vcmp.ge.f32.partialorder %v347_v1, %v124_v42  ;;  %vm213_vm3 = vcmask 1045508  }
  0x28   :  { %v129_v45 = vsel %vm125_vm4, %v128_v44, %v121_v41  ;;  %v132_v46 = vstv %s269_s17  ;;  %s275_s0 = sld [smem:[#allocation2 + $0xe]]  ;;  %v130_v47 = vsel %vm126_vm5, %v128_v44, %v122_v43  ;;  %vm215_vm4 = vcmask 1043456  }
  0x29   :  { %vm133_vm6 = vcmp.ge.f32.partialorder %v342_v0, %v132_v46  ;;  %v136_v48 = vstv %s270_s18  ;;  %s276_s23 = sld [smem:[#allocation4 + $0xf]]  ;;  %vm134_vm7 = vcmp.ge.f32.partialorder %v347_v1, %v132_v46 }
  0x2a   :  { %v137_v49 = vsel %vm133_vm6, %v136_v48, %v129_v45  ;;  %v140_v50 = vstv %s271_s19  ;;  %s277_s24 = sld [smem:[#allocation2 + $0xf]]  ;;  %v138_v51 = vsel %vm134_vm7, %v136_v48, %v130_v47 }
  0x2b   :  { %vm141_vm8 = vcmp.ge.f32.partialorder %v342_v0, %v140_v50  ;;  %v144_v52 = vstv %s272_s20  ;;  %s278_s25 = sld [smem:[#allocation4 + $0x10]]  ;;  %vm142_vm9 = vcmp.ge.f32.partialorder %v347_v1, %v140_v50 }
  0x2c   :  { %v145_v53 = vsel %vm141_vm8, %v144_v52, %v137_v49  ;;  %v148_v54 = vstv %s273_s21  ;;  %s279_s1 = sld [smem:[#allocation2 + $0x10]]  ;;  %v146_v55 = vsel %vm142_vm9, %v144_v52, %v138_v51 }
  0x2d   :  { %vm149_vm10 = vcmp.ge.f32.partialorder %v342_v0, %v148_v54  ;;  %v152_v56 = vstv %s274_s22  ;;  %s280_s26 = sld [smem:[#allocation4 + $0x11]]  ;;  %vm150_vm11 = vcmp.ge.f32.partialorder %v347_v1, %v148_v54 }
  0x2e   :  { %v153_v57 = vsel %vm149_vm10, %v152_v56, %v145_v53  ;;  %v156_v58 = vstv %s275_s0  ;;  %v154_v59 = vsel %vm150_vm11, %v152_v56, %v146_v55 }
  0x2f   :  { %vm157_vm12 = vcmp.ge.f32.partialorder %v342_v0, %v156_v58  ;;  %v160_v60 = vstv %s276_s23  ;;  %vm158_vm13 = vcmp.ge.f32.partialorder %v347_v1, %v156_v58 }
  0x30   :  { %v161_v61 = vsel %vm157_vm12, %v160_v60, %v153_v57  ;;  %v164_v62 = vstv %s277_s24  ;;  %v162_v63 = vsel %vm158_vm13, %v160_v60, %v154_v59 }
  0x31   :  { %vm165_vm14 = vcmp.ge.f32.partialorder %v342_v0, %v164_v62  ;;  %v168_v2 = vstv %s278_s25  ;;  %vm166_vm15 = vcmp.ge.f32.partialorder %v347_v1, %v164_v62 }
  0x32   :  { %v169_v3 = vsel %vm165_vm14, %v168_v2, %v161_v61  ;;  %v172_v4 = vstv %s279_s1  ;;  %v170_v5 = vsel %vm166_vm15, %v168_v2, %v162_v63 }
  0x33   :  { %vm173_vm0 = vcmp.ge.f32.partialorder %v342_v0, %v172_v4  ;;  %v176_v6 = vstv %s280_s26  ;;  %vm174_vm1 = vcmp.ge.f32.partialorder %v347_v1, %v172_v4 }
  0x34   :  { %v177_v7 = vsel %vm173_vm0, %v176_v6, %v169_v3  ;;  %v178_v8 = vsel %vm174_vm1, %v176_v6, %v170_v5 }
  0x35   :  { %v179_v9 = vand.u32 4294901760, %v177_v7  ;;  %v180_v10 = vand.u32 4294901760, %v178_v8  ;;  %v192_v11 = vshll.u32 %v177_v7, 16  ;;  %v193_v12 = vshll.u32 %v178_v8, 16 }
  0x37   :  { %181 = vst [vmem:[#allocation1] ss:$4 sm:$0xff] %v179_v9 }
  0x38   :  { %183 = vst [vmem:[#allocation1 + $0x20] ss:$4 sm:$0xff] %v180_v10 }
  0x3e   :  { %v184_v13 = vld.sshfl [vmem:[#allocation1] sm:$0xff pattern:$0x73625140]  ;;  %v185_v14 = vld.sshfl [vmem:[#allocation1 + $0x8] sm:$0xff pattern:$0x73625140] }
  0x3f   :  { %v186_v15 = vld.sshfl [vmem:[#allocation1 + $0x10] sm:$0xff pattern:$0x73625140]  ;;  %v187_v16 = vld.sshfl [vmem:[#allocation1 + $0x18] sm:$0xff pattern:$0x73625140] }
  0x40   :  { %194 = vst [vmem:[#allocation1] ss:$4 sm:$0xff] %v192_v11  ;;  %v205_v17 = vrot.slane %v185_v14, 6  ;;  %v206_v18 = vrot.slane %v186_v15, 4  ;;  %v207_v19 = vrot.slane %v187_v16, 2 }
  0x41   :  { %v188_v20 = vld.sshfl [vmem:[#allocation1 + $0x20] sm:$0xff pattern:$0x73625140]  ;;  %v189_v21 = vld.sshfl [vmem:[#allocation1 + $0x28] sm:$0xff pattern:$0x73625140] }
  0x42   :  { %v190_v22 = vld.sshfl [vmem:[#allocation1 + $0x30] sm:$0xff pattern:$0x73625140]  ;;  %v191_v23 = vld.sshfl [vmem:[#allocation1 + $0x38] sm:$0xff pattern:$0x73625140]  ;;  %v212_v27 = vsel %vm211_vm2, %v184_v13, %v205_v17  ;;  %v214_v28 = vsel %vm213_vm3, %v206_v18, %v207_v19 }
  0x43   :  { %196 = vst [vmem:[#allocation1 + $0x20] ss:$4 sm:$0xff] %v193_v12  ;;  %v208_v24 = vrot.slane %v189_v21, 6  ;;  %v209_v25 = vrot.slane %v190_v22, 4  ;;  %v210_v26 = vrot.slane %v191_v23, 2  ;;  %v216_v32 = vsel %vm215_vm4, %v212_v27, %v214_v28 }
  0x44   :  { %v222_v40 = vmul.f32 %v216_v32, %v342_v0 }
  0x45   :  { %v217_v33 = vsel %vm211_vm2, %v188_v20, %v208_v24  ;;  %v218_v34 = vsel %vm213_vm3, %v209_v25, %v210_v26 }
  0x46   :  { %v219_v45 = vsel %vm215_vm4, %v217_v33, %v218_v34 }
  0x47   :  { %v198_v29 = vld.sshfl [vmem:[#allocation1 + $0x8] sm:$0xff pattern:$0x73625140]  ;;  %v199_v30 = vld.sshfl [vmem:[#allocation1 + $0x10] sm:$0xff pattern:$0x73625140]  ;;  %v223_v52 = vmul.f32 %v219_v45, %v347_v1 }
  0x48   :  { %v200_v31 = vld.sshfl [vmem:[#allocation1 + $0x18] sm:$0xff pattern:$0x73625140]  ;;  %v224_v35 = vrot.slane %v198_v29, 6  ;;  %v225_v36 = vrot.slane %v199_v30, 4 }
  0x49   :  { %v226_v37 = vrot.slane %v200_v31, 2  ;;  %v197_v38 = vld.sshfl [vmem:[#allocation1] sm:$0xff pattern:$0x73625140] }
  0x4a   :  { %v202_v39 = vld.sshfl [vmem:[#allocation1 + $0x28] sm:$0xff pattern:$0x73625140]  ;;  %v230_v41 = vsel %vm211_vm2, %v197_v38, %v224_v35  ;;  %v203_v43 = vld.sshfl [vmem:[#allocation1 + $0x30] sm:$0xff pattern:$0x73625140] }
  0x4b   :  { %v231_v42 = vsel %vm213_vm3, %v225_v36, %v226_v37  ;;  %v204_v44 = vld.sshfl [vmem:[#allocation1 + $0x38] sm:$0xff pattern:$0x73625140]  ;;  %v227_v47 = vrot.slane %v202_v39, 6  ;;  %v228_v48 = vrot.slane %v203_v43, 4 }
  0x4c   :  { %v232_v46 = vsel %vm215_vm4, %v230_v41, %v231_v42  ;;  %v229_v49 = vrot.slane %v204_v44, 2  ;;  %v201_v51 = vld.sshfl [vmem:[#allocation1 + $0x20] sm:$0xff pattern:$0x73625140] }
  0x4d   :  { %v238_v50 = vadd.f32 %v232_v46, %v222_v40  ;;  %v233_v53 = vsel %vm211_vm2, %v201_v51, %v227_v47 }
  0x4e   :  { %v234_v0 = vsel %vm213_vm3, %v228_v48, %v229_v49 }
  0x4f   :  { %240 = vst [vmem:[%s406_s3] sm:$0xff] %v238_v50  ;;  %v235_v54 = vsel %vm215_vm4, %v233_v53, %v234_v0 }
  0x50   :  { %v239_v55 = vadd.f32 %v235_v54, %v223_v52 }
  0x52   :  { %241 = vst [vmem:[%s406_s3 + $0x8] sm:$0xff] %v239_v55 }
  0x53   :  { %246 = vsyncpa [#allocation3], 1 }
  0x54   :  { %247 = vsyncpa [#allocation5], 1 }

</bundles_post_ra>
